<compile_context>
chip_gen: v6e
topology: v6e:2x2x1
jax: 0.10.0
libtpu: 0.0.40
codegen_flags: <defaults>
</compile_context>

<pallas_src>
import math
import jax
import jax.numpy as jnp
from jax.experimental import pallas as pl
from jax.experimental.pallas import tpu as pltpu

_INV_SQRT2 = 1.0 / math.sqrt(2.0)


def _gelu_exact(x):
    # Matches torch.nn.functional.gelu default (erf form, not tanh approximation).
    return 0.5 * x * (1.0 + jax.lax.erf(x * _INV_SQRT2))


def _round_up(n, m):
    return ((n + m - 1) // m) * m


def _cdiv(a, b):
    return -(-a // b)


def _vmem_capacity_bytes():
    """Per-TensorCore VMEM capacity; conservative 64 MiB fallback (v7x)."""
    try:
        cap = getattr(pltpu.get_tpu_info(), "vmem_capacity_bytes", None)
        if cap:
            return int(cap)
    except Exception:
        pass
    return 64 << 20


def _pick_th(Hp, th_max):
    """Largest multiple of 128 that divides Hp and is <= th_max (Hp is mult of 128)."""
    best = 128
    for d in range(128, min(Hp, max(th_max, 128)) + 1, 128):
        if Hp % d == 0:
            best = d
    return best


# ----------------------------- kernels ------------------------------------------


def _mlp_kernel_accum_out(x_ref, w1_ref, b1_ref, w2_ref, b2_ref, o_ref):
    """f32-output path: o_ref (resident across the H axis) doubles as the accumulator.

    Grid = (M tiles, H slabs); H axis is 'arbitrary' (reduction).
    o = b2 + sum_h gelu(x @ W1[:, h] + b1[h]) @ W2[h, :]
    """
    h_idx = pl.program_id(1)

    @pl.when(h_idx == 0)
    def _init():
        # Fold the second bias into the accumulator init.
        o_ref[...] = jnp.broadcast_to(b2_ref[...], o_ref.shape)

    h = jnp.dot(x_ref[...], w1_ref[...], preferred_element_type=jnp.float32)
    h = _gelu_exact(h + b1_ref[...])                      # bias + exact GELU in f32
    o_ref[...] += jnp.dot(h.astype(w2_ref.dtype), w2_ref[...],
                          preferred_element_type=jnp.float32)


def _mlp_kernel_scratch_acc(x_ref, w1_ref, b1_ref, w2_ref, b2_ref, o_ref, acc_ref):
    """Generic-output path: f32 VMEM scratch accumulator, cast on the last H slab."""
    h_idx = pl.program_id(1)

    @pl.when(h_idx == 0)
    def _init():
        acc_ref[...] = jnp.broadcast_to(b2_ref[...], acc_ref.shape)

    h = jnp.dot(x_ref[...], w1_ref[...], preferred_element_type=jnp.float32)
    h = _gelu_exact(h + b1_ref[...])
    acc_ref[...] += jnp.dot(h.astype(w2_ref.dtype), w2_ref[...],
                            preferred_element_type=jnp.float32)

    @pl.when(h_idx == pl.num_programs(1) - 1)
    def _finalize():
        o_ref[...] = acc_ref[...].astype(o_ref.dtype)


# ----------------------------- wrapper ------------------------------------------


def pack_mlp_params(w1, b1, w2, b2, *, th=512, compute_dtype=jnp.bfloat16):
    """One-time weight prep (hoisted out of the steady-state forward path).

    w1: [E, 4E] (pre-transposed, in->out)   b1: [1, 4E] or [4E]
    w2: [4E, E]                             b2: [1, E]  or [E]
    Weights are cast to `compute_dtype` and zero-padded to lane-aligned shapes.
    """
    E, H = w1.shape
    Ep = _round_up(E, 128)
    th_pack = _round_up(min(th, _round_up(H, 128)), 128)
    Hp = _round_up(H, th_pack)

    w1q = jnp.pad(w1.astype(compute_dtype), ((0, Ep - E), (0, Hp - H)))
    w2q = jnp.pad(w2.astype(compute_dtype), ((0, Hp - H), (0, Ep - E)))
    b1q = jnp.pad(jnp.reshape(b1, (1, H)).astype(jnp.float32), ((0, 0), (0, Hp - H)))
    b2q = jnp.pad(jnp.reshape(b2, (1, E)).astype(jnp.float32), ((0, 0), (0, Ep - E)))
    return dict(w1=w1q, b1=b1q, w2=w2q, b2=b2q, E=E, H=H, Ep=Ep, Hp=Hp,
                compute_dtype=compute_dtype)


def mlp_forward(x, params, *, tm=1024, th=512, out_dtype=None):
    """y = gelu(x @ W1 + b1) @ W2 + b2 with pre-packed params (see pack_mlp_params).

    tm: row tile (tokens per grid step, default 1024 for weight reuse on v6e);
    th: hidden-dim slab width (keep >=256 when possible).  Both are auto-shrunk to
    fit ~75% of the detected per-core VMEM (v5e/v6e 128 MiB, v7x 64 MiB).
    """
    E, H, Ep, Hp = params["E"], params["H"], params["Ep"], params["Hp"]
    w1q, b1q, w2q, b2q = params["w1"], params["b1"], params["w2"], params["b2"]
    compute_dtype = params["compute_dtype"]

    orig_shape = x.shape
    assert orig_shape[-1] == E, "trailing dim of x must equal embedding size"
    if out_dtype is None:
        out_dtype = x.dtype
    f32_out = jnp.dtype(out_dtype) == jnp.dtype(jnp.float32)

    x2d = x.reshape(-1, E)
    M = x2d.shape[0]
    Mp = _round_up(M, 8)          # pad rows only to a sublane multiple (no whole-tile pad)

    csz = jnp.dtype(compute_dtype).itemsize
    osz = jnp.dtype(out_dtype).itemsize

    # --- Row tile: cap at tm, multiple of 8, and >=2 tiles for small M (v7x 2 TCs). ---
    tm_eff = _round_up(min(tm, Mp), 8)
    if Mp >= 16:
        tm_eff = min(tm_eff, _round_up(_cdiv(Mp, 2), 8))

    # --- Hidden slab: largest multiple of 128 that divides Hp and is <= th. ---
    th_eff = _pick_th(Hp, th)

    # --- VMEM-capacity-aware auto-shrink (target <= ~75% of detected capacity). ---
    cap = _vmem_capacity_bytes()
    budget = int(0.75 * cap)

    def vmem_need(tm_, th_):
        need = 2 * (tm_ * Ep * csz          # x tile (double buffered)
                    + Ep * th_ * csz        # W1 column slab
                    + th_ * 4               # b1 slab
                    + th_ * Ep * csz        # W2 row slab
                    + Ep * 4)               # b2
        if f32_out:
            need += 2 * tm_ * Ep * 4        # f32 out block doubles as accumulator
        else:
            need += 2 * tm_ * Ep * osz + tm_ * Ep * 4   # out blocks + f32 scratch
        return need

    while vmem_need(tm_eff, th_eff) > budget and th_eff > 128:
        th_eff = _pick_th(Hp, th_eff - 128)
    while vmem_need(tm_eff, th_eff) > budget and tm_eff > 8:
        tm_eff = max(8, _round_up(tm_eff // 2, 8))

    n_m = _cdiv(Mp, tm_eff)       # ragged last M tile: padded rows never reach real out
    n_h = Hp // th_eff

    # --- Per-call activation pad/cast only (weights were packed once). ---
    xq = jnp.pad(x2d.astype(compute_dtype), ((0, Mp - M), (0, Ep - E)))

    vmem_limit = int(min(max(vmem_need(tm_eff, th_eff) + (8 << 20), 32 << 20),
                         cap - (8 << 20)))

    rows = n_m * tm_eff
    cost = pl.CostEstimate(
        flops=4 * rows * Ep * Hp,               # two matmuls
        transcendentals=rows * Hp,              # erf on hidden activations
        bytes_accessed=(Mp * Ep * csz           # x
                        + n_m * 2 * Ep * Hp * csz   # weight re-streams per M tile
                        + (Hp + Ep) * 4         # biases
                        + Mp * Ep * osz),       # out
    )

    in_specs = [
        pl.BlockSpec((tm_eff, Ep), lambda i, h: (i, 0)),    # x row tile
        pl.BlockSpec((Ep, th_eff), lambda i, h: (0, h)),    # W1 column slab
        pl.BlockSpec((1, th_eff), lambda i, h: (0, h)),     # b1 slab
        pl.BlockSpec((th_eff, Ep), lambda i, h: (h, 0)),    # W2 row slab
        pl.BlockSpec((1, Ep), lambda i, h: (0, 0)),         # b2
    ]
    out_spec = pl.BlockSpec((tm_eff, Ep), lambda i, h: (i, 0))

    if f32_out:
        kernel = _mlp_kernel_accum_out
        scratch = []
    else:
        kernel = _mlp_kernel_scratch_acc
        scratch = [pltpu.VMEM((tm_eff, Ep), jnp.float32)]

    out_padded = pl.pallas_call(
        kernel,
        out_shape=jax.ShapeDtypeStruct((Mp, Ep), out_dtype),
        grid_spec=pltpu.PrefetchScalarGridSpec(
            num_scalar_prefetch=0,
            grid=(n_m, n_h),
            in_specs=in_specs,
            out_specs=out_spec,
            scratch_shapes=scratch,
        ),
        compiler_params=pltpu.CompilerParams(
            dimension_semantics=("parallel", "arbitrary"),
            vmem_limit_bytes=vmem_limit),
        cost_estimate=cost,
    )(xq, w1q, b1q, w2q, b2q)

    return out_padded[:M, :E].reshape(orig_shape)


def init_mlp_params(key, embedding_size):
    """nn.Linear-style init (U(+-1/sqrt(fan_in))); weights pre-transposed [in, out]."""
    E, H = embedding_size, 4 * embedding_size
    k1, k2, k3, k4 = jax.random.split(key, 4)
    lim1 = 1.0 / math.sqrt(E)
    lim2 = 1.0 / math.sqrt(H)
    w1 = jax.random.uniform(k1, (E, H), jnp.float32, -lim1, lim1)
    b1 = jax.random.uniform(k2, (1, H), jnp.float32, -lim1, lim1)
    w2 = jax.random.uniform(k3, (H, E), jnp.float32, -lim2, lim2)
    b2 = jax.random.uniform(k4, (1, E), jnp.float32, -lim2, lim2)
    return w1, b1, w2, b2


if __name__ == "__main__":
    key = jax.random.PRNGKey(0)
    batch, seq, embedding_size = 2, 8, 32          # small demo shapes; 4h = 128
    kx, kp = jax.random.split(key)

    x = jax.random.normal(kx, (batch, seq, embedding_size), jnp.float32)
    w1, b1, w2, b2 = init_mlp_params(kp, embedding_size)     # f32 master params

    # One-time weight cast/pad (hoisted out of the per-call path).
    params = pack_mlp_params(w1, b1, w2, b2, th=512, compute_dtype=jnp.bfloat16)

    out = mlp_forward(x, params, tm=1024, th=512)
    jax.block_until_ready(out)
    assert out.shape == x.shape and out.dtype == x.dtype

    x2d = x.reshape(-1, embedding_size)

    # Reference 1: identical bf16-in / f32-accumulate path as the kernel.
    hq = jnp.dot(x2d.astype(jnp.bfloat16), w1.astype(jnp.bfloat16),
                 preferred_element_type=jnp.float32) + b1
    hq = _gelu_exact(hq)
    ref_bf16 = jnp.dot(hq.astype(jnp.bfloat16), w2.astype(jnp.bfloat16),
                       preferred_element_type=jnp.float32) + b2
    assert jnp.allclose(out.reshape(-1, embedding_size), ref_bf16,
                        atol=2e-2, rtol=2e-2)

    # Reference 2: full-f32 torch semantics (loose check: bf16-weight deviation only).
    hf = _gelu_exact(jnp.dot(x2d, w1, preferred_element_type=jnp.float32) + b1)
    ref_f32 = jnp.dot(hf, w2, preferred_element_type=jnp.float32) + b2
    assert jnp.allclose(out.reshape(-1, embedding_size), ref_f32,
                        atol=7e-2, rtol=7e-2)

    print("KERNEL_OK")
</pallas_src>

<mosaic_0001>
module attributes {stable_mosaic.version = 11 : i64} {
  func.func @_mlp_kernel_accum_out(%arg0: i32, %arg1: i32, %arg2: memref<8x128xbf16, #tpu.memory_space<vmem>>, %arg3: memref<128x128xbf16, #tpu.memory_space<vmem>>, %arg4: memref<1x128xf32, #tpu.memory_space<vmem>>, %arg5: memref<128x128xbf16, #tpu.memory_space<vmem>>, %arg6: memref<1x128xf32, #tpu.memory_space<vmem>>, %arg7: memref<8x128xf32, #tpu.memory_space<vmem>>) attributes {dimension_semantics = [#tpu.dimension_semantics<parallel>, #tpu.dimension_semantics<arbitrary>], iteration_bounds = array<i64: 2, 1>, scalar_prefetch = 0 : i64, scratch_operands = 0 : i64, tpu.core_type = #tpu.core_type<tc>, window_params = [{transform_indices = @transform_0, window_bounds = array<i64: 8, 128>}, {transform_indices = @transform_1, window_bounds = array<i64: 128, 128>}, {transform_indices = @transform_2, window_bounds = array<i64: 1, 128>}, {transform_indices = @transform_3, window_bounds = array<i64: 128, 128>}, {pipeline_mode = #tpu.pipeline_mode<synchronous>, transform_indices = @transform_4, window_bounds = array<i64: 1, 128>}, {transform_indices = @transform_5, window_bounds = array<i64: 8, 128>}]} {
    %c0_i32 = arith.constant 0 : i32
    %0 = arith.cmpi eq, %arg1, %c0_i32 : i32
    %1 = arith.extui %0 : i1 to i32
    %c0_i32_0 = arith.constant 0 : i32
    %2 = arith.cmpi ne, %1, %c0_i32_0 : i32
    scf.if %2 {
      %c0_16 = arith.constant 0 : index
      %c0_17 = arith.constant 0 : index
      %23 = vector.load %arg6[%c0_16, %c0_17] : memref<1x128xf32, #tpu.memory_space<vmem>>, vector<1x128xf32>
      %24 = vector.shape_cast %23 : vector<1x128xf32> to vector<1x128xf32>
      %25 = vector.broadcast %24 : vector<1x128xf32> to vector<8x128xf32>
      %c0_18 = arith.constant 0 : index
      %c0_19 = arith.constant 0 : index
      %26 = vector.load %arg7[%c0_18, %c0_19] : memref<8x128xf32, #tpu.memory_space<vmem>>, vector<8x128xf32>
      tpu.vector_store %arg7[%c0_18, %c0_19], %25 {strides = array<i32>} : memref<8x128xf32, #tpu.memory_space<vmem>>, vector<8x128xf32>,
    } else {
    }
    %c0 = arith.constant 0 : index
    %c0_1 = arith.constant 0 : index
    %3 = vector.load %arg2[%c0, %c0_1] : memref<8x128xbf16, #tpu.memory_space<vmem>>, vector<8x128xbf16>
    %c0_2 = arith.constant 0 : index
    %c0_3 = arith.constant 0 : index
    %4 = vector.load %arg3[%c0_2, %c0_3] : memref<128x128xbf16, #tpu.memory_space<vmem>>, vector<128x128xbf16>
    %cst = arith.constant dense<0.000000e+00> : vector<8x128xf32>
    %5 = tpu.matmul %3, %4, %cst {dimension_numbers = #tpu.dot_dimension_numbers<[1], [0], [0], [1], [0, 0, 1, 1], [], []>} : vector<8x128xbf16>, vector<128x128xbf16>, vector<8x128xf32> -> vector<8x128xf32>
    %c0_4 = arith.constant 0 : index
    %c0_5 = arith.constant 0 : index
    %6 = vector.load %arg4[%c0_4, %c0_5] : memref<1x128xf32, #tpu.memory_space<vmem>>, vector<1x128xf32>
    %7 = vector.broadcast %6 : vector<1x128xf32> to vector<8x128xf32>
    %8 = arith.addf %5, %7 : vector<8x128xf32>
    %cst_6 = arith.constant 5.000000e-01 : f32
    %9 = vector.broadcast %cst_6 : f32 to vector<8x128xf32>
    %10 = arith.mulf %9, %8 : vector<8x128xf32>
    %cst_7 = arith.constant 0.707106769 : f32
    %11 = vector.broadcast %cst_7 : f32 to vector<8x128xf32>
    %12 = arith.mulf %8, %11 : vector<8x128xf32>
    %13 = math.erf %12 : vector<8x128xf32>
    %cst_8 = arith.constant 1.000000e+00 : f32
    %14 = vector.broadcast %cst_8 : f32 to vector<8x128xf32>
    %15 = arith.addf %14, %13 : vector<8x128xf32>
    %16 = arith.mulf %10, %15 : vector<8x128xf32>
    %c0_9 = arith.constant 0 : index
    %c0_10 = arith.constant 0 : index
    %17 = vector.load %arg7[%c0_9, %c0_10] : memref<8x128xf32, #tpu.memory_space<vmem>>, vector<8x128xf32>
    %18 = arith.truncf %16 : vector<8x128xf32> to vector<8x128xbf16>
    %c0_11 = arith.constant 0 : index
    %c0_12 = arith.constant 0 : index
    %19 = vector.load %arg5[%c0_11, %c0_12] : memref<128x128xbf16, #tpu.memory_space<vmem>>, vector<128x128xbf16>
    %cst_13 = arith.constant dense<0.000000e+00> : vector<8x128xf32>
    %20 = tpu.matmul %18, %19, %cst_13 {dimension_numbers = #tpu.dot_dimension_numbers<[1], [0], [0], [1], [0, 0, 1, 1], [], []>} : vector<8x128xbf16>, vector<128x128xbf16>, vector<8x128xf32> -> vector<8x128xf32>
    %21 = arith.addf %17, %20 : vector<8x128xf32>
    %c0_14 = arith.constant 0 : index
    %c0_15 = arith.constant 0 : index
    %22 = vector.load %arg7[%c0_14, %c0_15] : memref<8x128xf32, #tpu.memory_space<vmem>>, vector<8x128xf32>
    tpu.vector_store %arg7[%c0_14, %c0_15], %21 {strides = array<i32>} : memref<8x128xf32, #tpu.memory_space<vmem>>, vector<8x128xf32>,
    return
  }
  func.func @transform_0(%arg0: i32, %arg1: i32) -> (i32, i32) {
    %c0_i32 = arith.constant 0 : i32
    %c0_i32_0 = arith.constant 0 : i32
    return %arg0, %c0_i32 : i32, i32
  }
  func.func @transform_1(%arg0: i32, %arg1: i32) -> (i32, i32) {
    %c0_i32 = arith.constant 0 : i32
    %c0_i32_0 = arith.constant 0 : i32
    return %c0_i32, %arg1 : i32, i32
  }
  func.func @transform_2(%arg0: i32, %arg1: i32) -> (i32, i32) {
    %c0_i32 = arith.constant 0 : i32
    %c0_i32_0 = arith.constant 0 : i32
    return %c0_i32, %arg1 : i32, i32
  }
  func.func @transform_3(%arg0: i32, %arg1: i32) -> (i32, i32) {
    %c0_i32 = arith.constant 0 : i32
    %c0_i32_0 = arith.constant 0 : i32
    return %arg1, %c0_i32 : i32, i32
  }
  func.func @transform_4(%arg0: i32, %arg1: i32) -> (i32, i32) {
    %c0_i32 = arith.constant 0 : i32
    %c0_i32_0 = arith.constant 0 : i32
    %c0_i32_1 = arith.constant 0 : i32
    return %c0_i32, %c0_i32_0 : i32, i32
  }
  func.func @transform_5(%arg0: i32, %arg1: i32) -> (i32, i32) {
    %c0_i32 = arith.constant 0 : i32
    %c0_i32_0 = arith.constant 0 : i32
    return %arg0, %c0_i32 : i32, i32
  }
}

</mosaic_0001>

<bundles_post_ra>
// kernel: tpu_custom_call.1
= control target key start
LH: loop header
LB: loop body
LE: loop exit
PB: predicated region body
PF: predicated region fallthrough
CT: control target
= control target key end

     0   :  { %s1275_s0 = inlined_call_operand.hbm [shape: bf16[16,128], index: 0, kind: input, shape index: {}]   ;;  %s1276_s1 = inlined_call_operand.hbm [shape: bf16[128,128], index: 1, kind: input, shape index: {}]   ;;  %s1277_s2 = inlined_call_operand.vmem [shape: f32[1,128], index: 2, kind: input, shape index: {}]   ;;  %s1278_s3 = inlined_call_operand.hbm [shape: bf16[128,128], index: 3, kind: input, shape index: {}]   ;;  %s1279_s4 = inlined_call_operand.vmem [shape: f32[1,128], index: 4, kind: input, shape index: {}]   ;;  %s1280_s5 = inlined_call_operand.hbm [shape: f32[16,128], index: 5, kind: output, shape index: {}]  }
   0x1   :  { %1284 = sst [smem:[#allocation12_spill]] %s1276_s1 }
   0x2   :  { %10 = vsyncpa [#allocation3], 0 }
   0x3   :  { %12 = vsyncpa [#allocation3 + $0x1], 0 }
   0x4   :  { %13 = vsyncpa [#allocation6], 0 }
   0x5   :  { %14 = vsyncpa [#allocation4], 0 }
   0x6   :  { %16 = vsyncpa [#allocation4 + $0x1], 0  ;;  %s1079_s18 = smov 0   ;;  %s1081_s19 = smov 0  }
   0x7   :  { %s1083_s20 = smov 0   ;;  %s1085_s21 = smov 0  }
   0x8   :  { %s1087_s22 = smov 0   ;;  %s1089_s23 = smov 0  }
   0x9 LB: > { %s676_s24 = sadd.s32 4294967295, %s1039_s23   ;;  %s677_s25 = sadd.s32 4294967294, %s1039_s23   ;;  %s1039_s23 = sphi %s1089_s23, %s22_s23   ;;  %s1035_s22 = sphi %s1087_s22, %s1302_s22   ;;  %s1031_s21 = sphi %s1085_s21, %s1301_s21   ;;  %s1027_s20 = sphi %s1083_s20, %s1300_s20   ;;  %s1023_s19 = sphi %s1081_s19, %s1299_s19   ;;  %s1019_s18 = sphi %s1079_s18, %s1298_s18  }
   0xa   : > { %p54_p0 = scmp.ne.s32.totalorder %s1023_s19, %s1019_s18  ;;  %p1113_p1 = scmp.eq.s32.totalorder %s676_s24, 0 }
   0xb   : > { %p1117_p2 = scmp.eq.s32.totalorder %s676_s24, 1  ;;  %p183_p3 = scmp.eq.s32.totalorder %s677_s25, 1 }
   0xc   : > { %s1285_s26 = scalar_select %p1113_p1, 1, 0 }
   0xd   : > { %p1123_p4 = por %p1113_p1, %p54_p0  ;;  %p678_p5 = scmp.ge.s32.totalorder %s1039_s23, 1 }
   0xe   : > { %p1128_p6 = por %p183_p3, %p54_p0  ;;  %p190_p7 = scmp.lt.s32.totalorder %s1039_s23, 3 }
   0xf   : > { %s1287_s28 = scalar_select %p1123_p4, 1, 0 }
  0x10   : > { %s1288_s29 = scalar_select %p1128_p6, 1, 0 }
  0x11   : > { %p1133_p8 = pnand %p678_p5, %p190_p7  ;;  %s1041_s6 = smov [#allocation5]  }
  0x12   : > { %s204_s7 = sshll.u32 %s1041_s6, 4  ;;  %s1042_s9 = smov [#allocation7]   ;;  %s205_s7 = int_to_ptr.vmem [resolvable:$true] %s204_s7 }
  0x13   : > { %p782_p9 = pneg %p1133_p8  ;;  %s226_s10 = sshll.u32 %s1042_s9, 4  ;;  %s227_s10 = int_to_ptr.vmem [resolvable:$true] %s226_s10 }
  0x14   : > { %s886_s11 = scalar_lea.vmem %s205_s7, 1024  ;;  %p894_p5 = scmp.lt.s32.totalorder %s205_s7, %s205_s7 }
  0x15   : > { %p1142_p11 = pnand %p782_p9, %p1113_p1  ;;  %p887_p13 = scmp.ne.s32.totalorder %s205_s7, %s886_s11 }
  0x16   : > { %p895_p7 = scmp.lt.s32.totalorder %s886_s11, %s886_s11 }
  0x17   : > { %p877_p12 = pneg %p1142_p11 }
  0x18   : > { %p896_p10 = por %p895_p7, %p894_p5 }
  0x19   : > { %p889_p0 = pnand %p887_p13, %p877_p12 }
  0x1b   : > { %p890_p3 = pneg %p889_p0 }
  0x1d   : > { %p897_p9 = pnand %p896_p10, %p890_p3 }
  0x1f   : > { %900 = shalt.err (!%p897_p9)
}
  0x20   : > { %s1043_s12 = smov 64   ;;  %s1044_s13 = smov 4  }
  0x21   : > { %s1291_s1 = sld [smem:[#allocation12_spill]]  ;;  %s912_s16 = scalar_lea.vmem %s227_s10, 1024 }
  0x22   : > { %p913_p6 = scmp.ne.s32.totalorder %s227_s10, %s912_s16  ;;  %p920_p1 = scmp.lt.s32.totalorder %s227_s10, %s227_s10 }
  0x23   : > { %p921_p4 = scmp.lt.s32.totalorder %s912_s16, %s912_s16 }
  0x24   : > { %p915_p13 = pnand %p913_p6, %p877_p12 }
  0x25   : > { %p922_p5 = por %p921_p4, %p920_p1 }
  0x26   : > { %p916_p0 = pneg %p915_p13 }
  0x27   : > { %785 = dma.hbm_to_vmem [thread:$0]  (!%p1142_p11), %s1291_s1, 1024, %s205_s7, [#allocation6], %s1043_s12, %s1043_s12, %s1044_s13  }
  0x28   : > { %p923_p10 = pnand %p922_p5, %p916_p0 }
  0x2a   : > { %926 = shalt.err (!%p923_p10)
}
  0x2b   : > { %788 = dma.hbm_to_vmem [thread:$0]  (!%p1142_p11), %s1278_s3, 1024, %s227_s10, [#allocation6], %s1043_s12, %s1043_s12, %s1044_s13  }
  0x2c   : > { %s34_s25 = sadd.s32 1, %s1035_s22  ;;  %s41_s6 = sadd.s32 1, %s1027_s20 }
  0x2d   : > { %p36_p1 = scmp.ge.s32.totalorder %s34_s25, 2  ;;  %p48_p4 = scmp.ne.s32.totalorder %s1027_s20, %s1023_s19 }
  0x2e   : > { %p49_p6 = scmp.eq.s32.totalorder %s1039_s23, 0  ;;  %p799_p12 = scmp.lt.s32.totalorder %s1039_s23, 2 }
  0x2f   : > { %s1304_s25 = smov (%p36_p1, %s34_s25), 0  ;;  %p1174_p7 = por %p1117_p2, %p48_p4 }
  0x30   : > { %p50_p3 = por %p49_p6, %p48_p4  ;;  %s38_s8 = ssub.s32 %s1035_s22, %s1304_s25 }
  0x31   : > { %s243_s9 = sand.u32 1, %s1027_s20   ;;  %p39_p9 = scmp.eq.s32.totalorder %s38_s8, 0 }
  0x32   : > { %s683_s10 = sshll.u32 %s243_s9, 2  ;;  %s684_s11 = sshll.u32 %s1035_s22, 6 }
  0x33   : > { %s1183_s12 = scalar_select %p39_p9, %s1027_s20, %s41_s6  }
  0x34   : > { %s252_s15 = scalar_lea.hbm %s1275_s0, %s684_s11  ;;  %s247_s16 = scalar_lea.vmem [#allocation2], %s683_s10 }
  0x35   : > { %s254_s17 = sshll.u32 %s247_s16, 4  ;;  %p1190_p11 = pnand %p799_p12, %p50_p3  ;;  %s255_s17 = int_to_ptr.vmem [resolvable:$true] %s254_s17 }
  0x36   : > { %s244_s24 = scalar_lea.sflag [#allocation3], %s243_s9  ;;  %s940_s8 = scalar_lea.vmem %s255_s17, 64 }
  0x37   : > { %p929_p2 = pneg %p1190_p11  ;;  %p941_p13 = scmp.ne.s32.totalorder %s255_s17, %s940_s8 }
  0x38   : > { %s1045_s6 = smov [#allocation2]  }
  0x39   : > { %p943_p0 = pnand %p941_p13, %p929_p2  ;;  %s945_s1 = sshll.u32 %s1045_s6, 4  ;;  %s946_s1 = int_to_ptr.vmem [resolvable:$false] %s945_s1 }
  0x3a   : > { %s947_s11 = scalar_lea.vmem %s946_s1, 128  ;;  %p948_p10 = scmp.lt.s32.totalorder %s255_s17, %s946_s1 }
  0x3b   : > { %p944_p5 = pneg %p943_p0  ;;  %p949_p1 = scmp.lt.s32.totalorder %s947_s11, %s940_s8 }
  0x3d   : > { %p950_p4 = por %p949_p1, %p948_p10 }
  0x3f   : > { %p951_p6 = pnand %p950_p4, %p944_p5 }
  0x41   : > { %954 = shalt.err (!%p951_p6)
}
  0x42   : > { %792 = dma.hbm_to_vmem [thread:$0]  (!%p1190_p11), %s252_s15, 64, %s255_s17, %s244_s24  }
  0x43   : > { %263 = sbr.rel (%p1133_p8) target bundleno = 536 (0x218), region = 40  ;;  %s1201_s9 = sand.u32 (!%p1133_p8), 1, %s1023_s19  }
  0x44   : > { %s686_s10 = sshll.u32 (!%p1133_p8), %s1201_s9, 2  ;;  %s266_s13 = scalar_lea.sflag (!%p1133_p8), [#allocation3], %s1201_s9 }
  0x45   : > { %s1205_s14 = scalar_lea.vmem (!%p1133_p8), [#allocation2], %s686_s10  ;;  %p1294_p12 = scmp.ne.s32.totalorder (!%p1133_p8), %s1287_s28, 0 }
  0x48   : > { %1006 = dma.done.wait (%p1294_p12), %s266_s13, 64  }
  0x49   : > { %1008 = vsyncadd (%p1294_p12), %s266_s13, 4294967232  ;;  %p1295_p3 = scmp.ne.s32.totalorder %s1285_s26, 0 }
  0x4b   : > { %1010 = dma.done.wait (%p1295_p3), [#allocation6], 2048  }
  0x4c   : > { %1012 = vsyncadd (%p1295_p3), [#allocation6], 4294965248  ;;  %v1046_v0 = vmov 0.0   ;;  %vm1047_vm0 = vmmov 0   ;;  %v857_v1 = vld [vmem:[#allocation5 + $0x38] sm:$0xff]   ;;  %v858_v2 = vld [vmem:[#allocation5 + $0x30] sm:$0xff]  }
  0x4d   : > { %730 = vmatprep.subr.bf16.mxu0 %v1046_v0  ;;  %746 = vmatprep.mubr.msk.bf16.mxu0 %vm1047_vm0, %v1046_v0  ;;  %v859_v3 = vld [vmem:[#allocation5 + $0x28] sm:$0xff]   ;;  %v865_v4 = vld [vmem:[#allocation7 + $0x38] sm:$0xff]   ;;  %v860_v5 = vld [vmem:[#allocation5 + $0x20] sm:$0xff]   ;;  %s689_s28 = sshll.u32 %s1201_s9, 3  ;;  %s709_s16 = sshll.u32 %s1031_s21, 7 }
  0x4e   : > { %750 = vmatprep.subr.bf16.mxu1 %v1046_v0  ;;  %766 = vmatprep.mubr.msk.bf16.mxu1 %vm1047_vm0, %v1046_v0  ;;  %v866_v6 = vld [vmem:[#allocation7 + $0x30] sm:$0xff]   ;;  %v861_v7 = vld [vmem:[#allocation5 + $0x18] sm:$0xff]   ;;  %v863_v9 = vld [vmem:[#allocation5 + $0x8] sm:$0xff]   ;;  %s306_s17 = scalar_lea.vmem [#allocation8], %s689_s28  ;;  %s1227_s6 = scalar_lea.hbm %s1280_s5, %s709_s16 }
  0x4f   : > { %731 = vmatpush3.bf16.msra.mxu0 %v857_v1  ;;  %751 = vmatpush3.bf16.msra.mxu1 %v865_v4  ;;  %v862_v8 = vld [vmem:[#allocation5 + $0x10] sm:$0xff]   ;;  %v864_v10 = vld [vmem:[#allocation5] sm:$0xff]   ;;  %v324_v11 = vld [vmem:[%s1205_s14] sm:$0xf]  ;;  %s563_s27 = sshll.u32 %s306_s17, 4  ;;  %s550_s11 = scalar_lea.sflag [#allocation4], %s1201_s9  ;;  %s1229_s27 = int_to_ptr.vmem [resolvable:$true] %s563_s27 }
  0x50   : > { %732 = vmatprep.subr.bf16.mxu0 %v1046_v0  ;;  %752 = vmatprep.subr.bf16.mxu1 %v1046_v0  ;;  %v867_v12 = vld [vmem:[#allocation7 + $0x28] sm:$0xff]   ;;  %v868_v13 = vld [vmem:[#allocation7 + $0x20] sm:$0xff]   ;;  %v869_v14 = vld [vmem:[#allocation7 + $0x18] sm:$0xff]   ;;  %s955_s10 = scalar_lea.vmem %s1229_s27, 128  ;;  %s1048_s21 = smov [#allocation8]  }
  0x51   : > { %v870_v15 = vld [vmem:[#allocation7 + $0x10] sm:$0xff]   ;;  %v871_v16 = vld [vmem:[#allocation7 + $0x8] sm:$0xff]   ;;  %v872_v17 = vld [vmem:[#allocation7] sm:$0xff]   ;;  %p956_p8 = scmp.ne.s32.totalorder %s1229_s27, %s955_s10  ;;  %s959_s13 = sshll.u32 %s1048_s21, 4  ;;  %s960_s13 = int_to_ptr.vmem [resolvable:$false] %s959_s13 }
  0x52   : > { %v691_v18 = vld [vmem:[%s1277_s2] ss:$0 sm:$0xff]  ;;  %s961_s14 = scalar_lea.vmem %s960_s13, 256  ;;  %p962_p2 = scmp.lt.s32.totalorder %s1229_s27, %s960_s13 }
  0x53   : > { %733 = vmatpush3.bf16.msra.mxu0 %v858_v2  ;;  %753 = vmatpush3.bf16.msra.mxu1 %v866_v6  ;;  %v690_v30 = vld [vmem:[%s1279_s4] ss:$0 sm:$0xff]  ;;  %p957_p9 = pnand %p956_p8, %p1174_p7  ;;  %p963_p13 = scmp.lt.s32.totalorder %s961_s14, %s955_s10 }
  0x54   : > { %734 = vmatprep.subr.bf16.mxu0 %v1046_v0  ;;  %754 = vmatprep.subr.bf16.mxu1 %v1046_v0 }
  0x55   : > { %p958_p11 = pneg %p957_p9  ;;  %p964_p0 = por %p963_p13, %p962_p2 }
  0x57   : > { %735 = vmatpush3.bf16.msra.mxu0 %v859_v3  ;;  %755 = vmatpush3.bf16.msra.mxu1 %v867_v12  ;;  %p965_p5 = pnand %p964_p0, %p958_p11 }
  0x58   : > { %736 = vmatprep.subr.bf16.mxu0 %v1046_v0  ;;  %756 = vmatprep.subr.bf16.mxu1 %v1046_v0 }
  0x5b   : > { %737 = vmatpush3.bf16.msra.mxu0 %v860_v5  ;;  %757 = vmatpush3.bf16.msra.mxu1 %v868_v13 }
  0x5c   : > { %738 = vmatprep.subr.bf16.mxu0 %v1046_v0  ;;  %758 = vmatprep.subr.bf16.mxu1 %v1046_v0 }
  0x5f   : > { %739 = vmatpush3.bf16.msra.mxu0 %v861_v7  ;;  %759 = vmatpush3.bf16.msra.mxu1 %v869_v14 }
  0x60   : > { %740 = vmatprep.subr.bf16.mxu0 %v1046_v0  ;;  %760 = vmatprep.subr.bf16.mxu1 %v1046_v0 }
  0x63   : > { %741 = vmatpush3.bf16.msra.mxu0 %v862_v8  ;;  %761 = vmatpush3.bf16.msra.mxu1 %v870_v15 }
  0x64   : > { %742 = vmatprep.subr.bf16.mxu0 %v1046_v0  ;;  %762 = vmatprep.subr.bf16.mxu1 %v1046_v0 }
  0x67   : > { %743 = vmatpush3.bf16.msra.mxu0 %v863_v9  ;;  %763 = vmatpush3.bf16.msra.mxu1 %v871_v16 }
  0x68   : > { %744 = vmatprep.subr.bf16.mxu0 %v1046_v0  ;;  %764 = vmatprep.subr.bf16.mxu1 %v1046_v0 }
  0x6b   : > { %745 = vmatpush3.bf16.msra.mxu0 %v864_v10  ;;  %765 = vmatpush3.bf16.msra.mxu1 %v872_v17 }
  0x6e   : > { %747 = vmatmul.mubr.bf16.vlgmr.msra.gmra.mxu0 %v324_v11 }
 0x12e   : > { %v430_v19 = vpop.f32.mrf.mxu0 }
 0x12f   : > { %v431_v20 = vadd.f32 %v691_v18, %v430_v19 }
 0x130   : > { %v748_v21 = vpop.f32.mrf.mxu0 }
 0x131   : > { %v437_v22 = vmul.f32 0.70710677, %v431_v20  ;;  %v436_v26 = vmul.f32 0.5, %v431_v20 }
 0x132   : > { %v433_v23 = vpop.f32.mrf.mxu0 }
 0x133   : > { %873 = verf.f32 %v437_v22 }
 0x134   : > { %v749_v24 = vpop.f32.mrf.mxu0 }
 0x140   : > { %v874_v25 = vpop.eup %873 }
 0x141   : > { %v439_v27 = vadd.f32 1.0, %v874_v25 }
 0x143   : > { %v440_v28 = vmul.f32 %v439_v27, %v436_v26 }
 0x145   : > { %v442_v29 = vpack.c.bf16 %v440_v28, %v440_v28 }
 0x147   : > { %767 = vmatmul.mubr.bf16.vlgmr.msra.gmra.mxu1 %v442_v29 }
 0x207   : > { %v541_v31 = vpop.f32.mrf.mxu1 }
 0x208   : > { %v547_v32 = vadd.f32 %v690_v30, %v541_v31 }
 0x209   : > { %v768_v33 = vpop.f32.mrf.mxu1 }
 0x20a   : > { %548 = vst [vmem:[%s306_s17] sm:$0xff] %v547_v32 }
 0x20b   : > { %v544_v34 = vpop.f32.mrf.mxu1 }
 0x20c   : > { %968 = shalt.err (!%p965_p5)
}
 0x20d   : > { %s969_s1 = scalar_lea.hbm %s1227_s6, 128  ;;  %s973_s28 = scalar_lea.hbm %s1280_s5, 256 }
 0x20e   : > { %p970_p10 = scmp.ne.s32.totalorder %s1227_s6, %s969_s1  ;;  %p974_p6 = scmp.lt.s32.totalorder %s1227_s6, %s1280_s5 }
 0x20f   : > { %p975_p12 = scmp.lt.s32.totalorder %s973_s28, %s969_s1 }
 0x210   : > { %p971_p1 = pnand %p970_p10, %p1174_p7 }
 0x211   : > { %p976_p3 = por %p975_p12, %p974_p6 }
 0x212   : > { %p972_p4 = pneg %p971_p1 }
 0x214   : > { %p977_p8 = pnand %p976_p3, %p972_p4 }
 0x216   : > { %980 = shalt.err (!%p977_p8)
}
 0x217   : > { %780 = dma.vmem_to_hbm [thread:$0]  (%p1174_p7), %s1229_s27, 128, %s1227_s6, %s550_s11   ;;  %v769_v35 = vpop.f32.mrf.mxu1 }
 0x218 PF: > { %s575_s16 = sand.u32 1, %s1019_s18   ;;  %p1296_p9 = scmp.ne.s32.totalorder %s1288_s29, 0 }
 0x219   : > { %p1297_p11 = scmp.ge.s32.totalorder %s1039_s23, 2  ;;  %s576_s17 = scalar_lea.sflag [#allocation4], %s575_s16 }
 0x21b   : > { %p794_p2 = pnand %p1297_p11, %p1296_p9 }
 0x21d   : > { %p795_p13 = pneg %p794_p2 }
 0x21f   : > { %1014 = dma.done.wait (%p795_p13), %s576_s17, 128  }
 0x220   : > { %1016 = vsyncadd (%p795_p13), %s576_s17, 4294967168  ;;  %s22_s23 = sadd.s32 1, %s1039_s23   ;;  %s1298_s18 = smov %s1023_s19 }
 0x221   : > { %p19_p0 = scmp.ge.s32.totalorder %s22_s23, 4   ;;  %s1299_s19 = smov %s1027_s20 }
 0x222   : > { %s1300_s20 = smov %s1183_s12  ;;  %s1301_s21 = smov %s1035_s22 }
 0x223   : > { %s1302_s22 = smov %s1304_s25  ;;  %21 = sbr.rel (!%p19_p0) target bundleno = 9 (0x9), region = 102 }
 0x228   :  { %581 = vsyncpa [#allocation3], 1 }
 0x229   :  { %583 = vsyncpa [#allocation3 + $0x1], 1 }
 0x22a   :  { %584 = vsyncpa [#allocation6], 1 }
 0x22b   :  { %585 = vsyncpa [#allocation4], 1 }
 0x22c   :  { %587 = vsyncpa [#allocation4 + $0x1], 1 }

</bundles_post_ra>
